<compile_context>
chip_gen: v5e
topology: v5e:2x2
jax: 0.10.0
libtpu: 0.0.40
codegen_flags: <defaults>
</compile_context>

<pallas_src>
import jax
import jax.numpy as jnp
from jax.experimental import pallas as pl
from jax.experimental.pallas import tpu as pltpu


def _round_up(v, m):
    return (v + m - 1) // m * m


def _largest_aligned_divisor(n, cap):
    """Largest divisor d of n with d <= cap and (d % 8 == 0 or d == n).

    Preference: multiples of 16 (bf16 sublane packing), then 8, then the full dim
    itself (legal: blocks equal to the array dim are exempt from the (8,128) rule)."""
    divs = set()
    i = 1
    while i * i <= n:
        if n % i == 0:
            divs.add(i)
            divs.add(n // i)
        i += 1
    cands = [d for d in divs if d <= cap and (d % 8 == 0 or d == n)]
    if not cands:
        return None
    for align in (16, 8, 1):
        aligned = [d for d in cands if d % align == 0]
        if aligned:
            return max(aligned)
    return None


def _pick_m_tiling(m, cap):
    """Pick (TM, M_pad).  Prefer a divisor of M (no pad copy, no dead MXU rows);
    pad only if the best divisor would make the row tile degenerate."""
    d = _largest_aligned_divisor(m, cap)
    if d is not None and d >= min(m, 128):
        return d, m
    tm = min(cap, _round_up(m, 16))
    return tm, _round_up(m, tm)


def _pick_n_tiling(k_vmem, n_pad, weight_budget_bytes, itemsize):
    """Largest 128-aligned divisor of n_pad whose (double-buffered) weight tile fits."""
    if n_pad <= 128 or 2 * k_vmem * n_pad * itemsize <= weight_budget_bytes:
        return n_pad
    n_blocks = n_pad // 128
    for k in range(2, n_blocks + 1):
        if n_blocks % k == 0 and 2 * k_vmem * (n_pad // k) * itemsize <= weight_budget_bytes:
            return n_pad // k
    return 128


def _patch_embed_kernel(x_ref, w_ref, b_ref, o_ref):
    # One (TM, K) x (K, TN) MXU matmul per grid step, f32 accumulation.
    acc = jnp.dot(x_ref[...], w_ref[...], preferred_element_type=jnp.float32)
    # Bias add + final cast in f32 on the VPU; lane-dense (128-multiple) store.
    o_ref[...] = (acc + b_ref[...]).astype(o_ref.dtype)


def patch_embedding(x, weight, bias, patch_size, *,
                    compute_dtype=jnp.bfloat16, out_dtype=None,
                    tm_max=1024, vmem_budget_bytes=40 * 1024 * 1024):
    """x: (B, C, H, W) NCHW.  weight: (embed_dim, C, P, P) OIHW.  bias: (embed_dim,)."""
    B, C, H, W = x.shape
    P = patch_size
    if H % P != 0 or W % P != 0:
        raise ValueError("image dimensions must be divisible by the patch size")
    gh, gw = H // P, W // P
    num_patches = gh * gw
    embed_dim = weight.shape[0]
    K = C * P * P
    M = B * num_patches
    out_dtype = x.dtype if out_dtype is None else jnp.dtype(out_dtype)
    out_itemsize = jnp.dtype(out_dtype).itemsize
    cdt_itemsize = jnp.dtype(compute_dtype).itemsize

    # --- glue: one XLA copy = compute-dtype cast + non-overlapping patch extraction in
    # the conv's (c, kh, kw) reduction order.  (B,C,H,W) -> (B,gh,gw,C,P,P) -> (M, K).
    patches = (x.astype(compute_dtype)
                 .reshape(B, C, gh, P, gw, P)
                 .transpose(0, 2, 4, 1, 3, 5)
                 .reshape(M, K))

    # conv weight (O, I, P, P) -> (K, N) in matching K order; bias stays f32.
    n_pad = _round_up(embed_dim, 128)          # lane-dense output stores
    w_mat = weight.astype(compute_dtype).reshape(embed_dim, K).T
    b_mat = bias.astype(jnp.float32).reshape(1, embed_dim)
    if n_pad != embed_dim:
        w_mat = jnp.pad(w_mat, ((0, 0), (0, n_pad - embed_dim)))
        b_mat = jnp.pad(b_mat, ((0, 0), (0, n_pad - embed_dim)))
    # NOTE: K is *not* padded -- the kernel uses the full-K block, avoiding a pad copy.

    # --- tiling / VMEM budget ----------------------------------------------------
    k_vmem = _round_up(K, 128)                 # what the K lanes occupy inside VMEM
    tn = _pick_n_tiling(k_vmem, n_pad, vmem_budget_bytes // 3, cdt_itemsize)
    fixed_bytes = 2 * k_vmem * tn * cdt_itemsize + 2 * 8 * n_pad * 4     # weight + bias bufs
    per_row_bytes = 2 * k_vmem * cdt_itemsize + 2 * tn * out_itemsize    # patches + out bufs
    cap = min(tm_max, max(16, (vmem_budget_bytes - fixed_bytes) // per_row_bytes))
    cap = max(16, int(cap) // 16 * 16)
    tm, m_pad = _pick_m_tiling(M, cap)
    if m_pad != M:                              # rare: M has no usable divisor <= cap
        patches = jnp.pad(patches, ((0, m_pad - M), (0, 0)))
    grid_m = m_pad // tm
    grid_n = n_pad // tn

    # Explicit scoped-VMEM limit: our buffers + headroom, capped at 48 MiB so the same
    # config stays safe on v7x (64 MiB physical) as well as v5e/v6e (128 MiB).
    vmem_need = fixed_bytes + tm * per_row_bytes + (4 << 20)
    vmem_limit = int(min(max(vmem_need, 32 << 20), 48 << 20))

    cost = pl.CostEstimate(
        flops=2 * M * K * n_pad,
        transcendentals=0,
        bytes_accessed=int(grid_n * m_pad * K * cdt_itemsize     # patches (re-read per N tile)
                           + K * n_pad * cdt_itemsize            # weight (read once)
                           + n_pad * 4                           # bias
                           + m_pad * n_pad * out_itemsize),      # output
    )

    out = pl.pallas_call(
        _patch_embed_kernel,
        out_shape=jax.ShapeDtypeStruct((m_pad, n_pad), out_dtype),
        grid_spec=pltpu.PrefetchScalarGridSpec(
            num_scalar_prefetch=0,
            grid=(grid_n, grid_m),                               # M innermost
            in_specs=[
                pl.BlockSpec((tm, K), lambda j, i: (i, 0)),      # patch rows: stream
                pl.BlockSpec((K, tn), lambda j, i: (0, j)),      # weight: resident per N tile
                pl.BlockSpec((1, tn), lambda j, i: (0, j)),      # bias:   resident per N tile
            ],
            out_specs=pl.BlockSpec((tm, tn), lambda j, i: (i, j)),
        ),
        compiler_params=pltpu.CompilerParams(
            # Both axes are embarrassingly parallel (no cross-step accumulation).
            # TODO(synk): on v7x check xprof shows both TensorCores busy; if not, switch
            # the M axis to pltpu.CORE_PARALLEL / pl.core_map.
            dimension_semantics=("parallel", "parallel"),
            vmem_limit_bytes=vmem_limit,
        ),
        cost_estimate=cost,
    )(patches, w_mat, b_mat)

    # Strip padding (no-op when already aligned), restore (B, num_patches, embed_dim).
    return out[:M, :embed_dim].reshape(B, num_patches, embed_dim)


if __name__ == "__main__":
    # Small shapes consistent with the module.
    B, C = 2, 4
    image_size = (16, 16)
    patch_size = 4
    embed_dim = 32

    key = jax.random.PRNGKey(0)
    kx, kw, kb = jax.random.split(key, 3)
    x = jax.random.normal(kx, (B, C, *image_size), dtype=jnp.float32)
    # Shapes match nn.Conv2d(channels, embed_dim, kernel=patch, stride=patch).
    weight = jax.random.normal(kw, (embed_dim, C, patch_size, patch_size), dtype=jnp.float32) * 0.02
    bias = jax.random.normal(kb, (embed_dim,), dtype=jnp.float32) * 0.02

    fn = jax.jit(patch_embedding,
                 static_argnames=("patch_size", "compute_dtype", "out_dtype",
                                  "tm_max", "vmem_budget_bytes"))
    out = jax.block_until_ready(fn(x, weight, bias, patch_size=patch_size))

    num_patches = (image_size[0] // patch_size) * (image_size[1] // patch_size)
    assert out.shape == (B, num_patches, embed_dim)
    assert out.dtype == x.dtype

    # Reference 1: strided conv in full f32 (true module semantics) -- loose tol
    # because the kernel feeds the MXU in bf16 (f32 accumulation).
    conv = jax.lax.conv_general_dilated(
        x, weight, window_strides=(patch_size, patch_size), padding="VALID",
        dimension_numbers=("NCHW", "OIHW", "NCHW"),
    ) + bias.reshape(1, embed_dim, 1, 1)
    ref_f32 = conv.reshape(B, embed_dim, -1).transpose(0, 2, 1)
    assert jnp.allclose(out, ref_f32, atol=2e-2, rtol=2e-2), "mismatch vs f32 conv reference"

    # Reference 2: same conv on bf16-rounded inputs (what the MXU sees) -- tight tol.
    xq = x.astype(jnp.bfloat16).astype(jnp.float32)
    wq = weight.astype(jnp.bfloat16).astype(jnp.float32)
    convq = jax.lax.conv_general_dilated(
        xq, wq, window_strides=(patch_size, patch_size), padding="VALID",
        dimension_numbers=("NCHW", "OIHW", "NCHW"),
    ) + bias.reshape(1, embed_dim, 1, 1)
    ref_q = convq.reshape(B, embed_dim, -1).transpose(0, 2, 1)
    assert jnp.allclose(out, ref_q, atol=1e-3, rtol=1e-3), "mismatch vs bf16-rounded reference"

    # bf16-output option (halves output HBM stores when the consumer accepts it).
    out_bf16 = jax.block_until_ready(
        fn(x, weight, bias, patch_size=patch_size, out_dtype=jnp.bfloat16))
    assert out_bf16.dtype == jnp.bfloat16
    assert jnp.allclose(out_bf16.astype(jnp.float32), ref_q, atol=2e-2, rtol=2e-2)

    print("KERNEL_OK")
</pallas_src>

<mosaic_0001>
module attributes {stable_mosaic.version = 11 : i64} {
  func.func @_patch_embed_kernel(%arg0: i32, %arg1: i32, %arg2: memref<32x64xbf16, #tpu.memory_space<vmem>>, %arg3: memref<64x128xbf16, #tpu.memory_space<vmem>>, %arg4: memref<1x128xf32, #tpu.memory_space<vmem>>, %arg5: memref<32x128xf32, #tpu.memory_space<vmem>>) attributes {dimension_semantics = [#tpu.dimension_semantics<parallel>, #tpu.dimension_semantics<parallel>], iteration_bounds = array<i64: 1, 1>, scalar_prefetch = 0 : i64, scratch_operands = 0 : i64, tpu.core_type = #tpu.core_type<tc>, window_params = [{transform_indices = @transform_0, window_bounds = array<i64: 32, 64>}, {transform_indices = @transform_1, window_bounds = array<i64: 64, 128>}, {transform_indices = @transform_2, window_bounds = array<i64: 1, 128>}, {transform_indices = @transform_3, window_bounds = array<i64: 32, 128>}]} {
    %c0 = arith.constant 0 : index
    %c0_0 = arith.constant 0 : index
    %0 = vector.load %arg2[%c0, %c0_0] : memref<32x64xbf16, #tpu.memory_space<vmem>>, vector<32x64xbf16>
    %c0_1 = arith.constant 0 : index
    %c0_2 = arith.constant 0 : index
    %1 = vector.load %arg3[%c0_1, %c0_2] : memref<64x128xbf16, #tpu.memory_space<vmem>>, vector<64x128xbf16>
    %cst = arith.constant dense<0.000000e+00> : vector<32x128xf32>
    %2 = tpu.matmul %0, %1, %cst {dimension_numbers = #tpu.dot_dimension_numbers<[1], [0], [0], [1], [0, 0, 1, 1], [], []>} : vector<32x64xbf16>, vector<64x128xbf16>, vector<32x128xf32> -> vector<32x128xf32>
    %c0_3 = arith.constant 0 : index
    %c0_4 = arith.constant 0 : index
    %3 = vector.load %arg4[%c0_3, %c0_4] : memref<1x128xf32, #tpu.memory_space<vmem>>, vector<1x128xf32>
    %4 = vector.broadcast %3 : vector<1x128xf32> to vector<32x128xf32>
    %5 = arith.addf %2, %4 : vector<32x128xf32>
    %c0_5 = arith.constant 0 : index
    %c0_6 = arith.constant 0 : index
    %6 = vector.load %arg5[%c0_5, %c0_6] : memref<32x128xf32, #tpu.memory_space<vmem>>, vector<32x128xf32>
    tpu.vector_store %arg5[%c0_5, %c0_6], %5 {strides = array<i32>} : memref<32x128xf32, #tpu.memory_space<vmem>>, vector<32x128xf32>,
    return
  }
  func.func @transform_0(%arg0: i32, %arg1: i32) -> (i32, i32) {
    %c0_i32 = arith.constant 0 : i32
    %c0_i32_0 = arith.constant 0 : i32
    return %arg1, %c0_i32 : i32, i32
  }
  func.func @transform_1(%arg0: i32, %arg1: i32) -> (i32, i32) {
    %c0_i32 = arith.constant 0 : i32
    %c0_i32_0 = arith.constant 0 : i32
    return %c0_i32, %arg0 : i32, i32
  }
  func.func @transform_2(%arg0: i32, %arg1: i32) -> (i32, i32) {
    %c0_i32 = arith.constant 0 : i32
    %c0_i32_0 = arith.constant 0 : i32
    return %c0_i32, %arg0 : i32, i32
  }
  func.func @transform_3(%arg0: i32, %arg1: i32) -> (i32, i32) {
    %c0_i32 = arith.constant 0 : i32
    return %arg1, %arg0 : i32, i32
  }
}

</mosaic_0001>

<bundles_post_ra>
// kernel: patch_embedding.1
= control target key start
LH: loop header
LB: loop body
LE: loop exit
PB: predicated region body
PF: predicated region fallthrough
CT: control target
= control target key end

     0   :  { %s227_s0 = inlined_call_operand.vmem [shape: bf16[32,64], index: 0, kind: input, shape index: {}]   ;;  %s228_s1 = inlined_call_operand.vmem [shape: bf16[64,128], index: 1, kind: input, shape index: {}]   ;;  %s229_s2 = inlined_call_operand.vmem [shape: f32[1,128], index: 2, kind: input, shape index: {}]   ;;  %s230_s3 = inlined_call_operand.hbm [shape: f32[32,128], index: 3, kind: output, shape index: {}]  }
   0x1   :  { %v145_v0 = vld [vmem:[%s228_s1 + $0x18] sm:$0xff]  ;;  %v144_v1 = vld [vmem:[%s228_s1 + $0x10] sm:$0xff] }
   0x2   :  { %77 = vmatpush.bf16.msra.mxu0 %v145_v0  ;;  %146 = vmatpush.bf16.msra.mxu1 %v145_v0 }
   0x3   :  { %8 = vsyncpa [#allocation3], 0  ;;  %v143_v2 = vld [vmem:[%s228_s1 + $0x8] sm:$0xff]  ;;  %v142_v3 = vld [vmem:[%s228_s1] sm:$0xff]  ;;  %vm66_vm0 = vcmask 523264   ;;  %s180_s1 = smov [#allocation2]  }
   0x4   :  { %v140_v4 = vld [vmem:[%s227_s0] sm:$0xff]  ;;  %v141_v5 = vld [vmem:[%s227_s0 + $0x8] sm:$0xff]  ;;  %s100_s26 = sshll.u32 %s180_s1, 4  ;;  %s102_s0 = sshll.u32 %s230_s3, 4  ;;  %s101_s26 = int_to_ptr.vmem [resolvable:$true] %s100_s26  ;;  %s103_s0 = int_to_ptr.hbm [resolvable:$true] %s102_s0 }
   0x5   :  { %v153_v6 = vld [vmem:[%s229_s2] ss:$0 sm:$0xff]  ;;  %s181_s2 = smov 128   ;;  %s182_s29 = smov 8  }
   0x6   :  { %78 = vmatpush.bf16.msra.mxu0 %v144_v1  ;;  %147 = vmatpush.bf16.msra.mxu1 %v144_v1 }
   0xa   :  { %79 = vmatpush.bf16.msra.mxu0 %v143_v2  ;;  %148 = vmatpush.bf16.msra.mxu1 %v143_v2 }
   0xe   :  { %80 = vmatpush.bf16.msra.mxu0 %v142_v3  ;;  %149 = vmatpush.bf16.msra.mxu1 %v142_v3 }
  0x11   :  { %138 = vmatmul.msk.bf16.vlgmr.msra.gmra.mxu0 %vm66_vm0, %v140_v4  ;;  %139 = vmatmul.msk.bf16.vlgmr.msra.gmra.mxu1 %vm66_vm0, %v141_v5 }
  0x8e   :  { %v82_v7 = vpop.f32.mrf.mxu0  ;;  %v87_v8 = vpop.f32.mrf.mxu1 }
  0x8f   :  { %v83_v9 = vadd.f32 %v153_v6, %v82_v7  ;;  %v88_v10 = vadd.f32 %v153_v6, %v87_v8 }
  0x91   :  { %92 = vst [vmem:[#allocation2] sm:$0xff] %v83_v9 }
  0x92   :  { %94 = vst [vmem:[#allocation2 + $0x10] sm:$0xff] %v88_v10 }
  0x96   :  { %v84_v11 = vpop.f32.mrf.mxu0  ;;  %v89_v12 = vpop.f32.mrf.mxu1 }
  0x97   :  { %v85_v13 = vadd.f32 %v153_v6, %v84_v11  ;;  %v90_v14 = vadd.f32 %v153_v6, %v89_v12 }
  0x99   :  { %93 = vst [vmem:[#allocation2 + $0x8] sm:$0xff] %v85_v13 }
  0x9a   :  { %95 = vst [vmem:[#allocation2 + $0x18] sm:$0xff] %v90_v14 }
  0x9b   :  { %108 = dma.vmem_to_hbm [thread:$0]  %s101_s26, 512, %s103_s0, [#allocation3], %s181_s2, %s181_s2, %s182_s29  }
  0x9c   :  { %178 = dma.done.wait [#allocation3], 512  }
  0x9d   :  { %179 = vsyncadd [#allocation3], 4294966784 }
  0x9e   :  { %113 = vsyncpa [#allocation3], 1 }

</bundles_post_ra>
